<compile_context>
chip_gen: v5e
topology: v5e:2x2
jax: 0.10.0
libtpu: 0.0.40
codegen_flags: <defaults>
</compile_context>

<pallas_src>
import functools

import jax
import jax.numpy as jnp
import numpy as np
from jax import lax
from jax.experimental import pallas as pl
from jax.experimental.pallas import tpu as pltpu

EPS = 1e-5  # nn.BatchNorm2d default eps


def gsop_kernel(x_ref, w1_ref, mflat_ref, const_ref, out_ref, *, batch, width):
    TB, W = batch, width
    C, TBW = x_ref.shape
    SQ = w1_ref.shape[0]

    x = x_ref[...]                                                   # (C, TB*W), native dtype

    # pw_conv1: ONE full-width MXU matmul (bias cancels exactly in the
    # zero-mean step, so it is dropped at trace time).
    scale = jnp.dot(w1_ref[...], x,
                    preferred_element_type=jnp.float32)              # (SQ, TB*W)

    # Per-batch-segment zero mean via a 0/1 segment matrix (MXU, lane-dense).
    col = lax.broadcasted_iota(jnp.int32, (TB, TBW), 1)
    row = lax.broadcasted_iota(jnp.int32, (TB, TBW), 0)
    seg = ((col >= row * W) & (col < (row + 1) * W)).astype(jnp.float32)
    sums = lax.dot_general(scale, seg, (((1,), (1,)), ((), ())),
                           preferred_element_type=jnp.float32)       # (SQ, TB)
    zm = scale - jnp.dot(sums * (1.0 / W), seg,
                         preferred_element_type=jnp.float32)         # (SQ, TB*W)

    # Per-batch covariance (batched MXU dot): cov[b] = Z_b @ Z_b^T / (W - 1).
    zm3 = jnp.swapaxes(zm.T.reshape(TB, W, SQ), 1, 2)                # (TB, SQ, W)
    cov = lax.dot_general(zm3, zm3, (((2,), (2,)), ((0,), (0,))),
                          preferred_element_type=jnp.float32) * (1.0 / (W - 1))

    # Fused BN(eval) + rw_conv + pw_conv2 tail: ONE (TB, SQ^2) @ (SQ^2, C) dot.
    # covcat[b, g*SQ + k] == cov[b, g, k]; built with a lane concat (always
    # lowerable).  TODO(synk): for large SQ replace the slice/concat pair with
    # a single minor-merging reshape once that relayout is guaranteed.
    covcat = jnp.concatenate([cov[:, g, :] for g in range(SQ)], axis=1)
    y = jnp.dot(covcat, mflat_ref[...],
                preferred_element_type=jnp.float32) + const_ref[...]  # (TB, C)

    # Channel re-scale: expand y back to (C, TB*W) with the segment matrix.
    ybig = jnp.dot(y.T, seg, preferred_element_type=jnp.float32)      # (C, TB*W)
    out_ref[...] = (ybig * x).astype(out_ref.dtype)


def _sublane_tile(dtype):
    return max(8, 32 // jnp.dtype(dtype).itemsize)


def _padded_bytes(shape, dtype):
    """VMEM footprint of an array including (sublane, 128-lane) tile padding."""
    shape = tuple(int(s) for s in shape)
    if len(shape) == 1:
        shape = (1,) + shape
    *major, sub, lane = shape
    st = _sublane_tile(dtype)
    sub_p = ((sub + st - 1) // st) * st
    lane_p = ((lane + 127) // 128) * 128
    n = 1
    for m in major:
        n *= m
    return n * sub_p * lane_p * jnp.dtype(dtype).itemsize


def _vmem_capacity_bytes():
    try:
        return int(pltpu.get_tpu_info().vmem_capacity_bytes)
    except Exception:
        return 64 << 20  # conservative default (v7x-sized)


def _block_vmem_need(TB, C, W, SQ, x_dtype):
    """Padded VMEM bytes for one grid step: double-buffered I/O blocks,
    invariant params, and the dominant in-kernel f32 intermediates."""
    TBW = TB * W
    f32 = jnp.float32
    io = 2 * 2 * _padded_bytes((C, TBW), x_dtype)            # x + out, double-buffered
    params = 2 * (_padded_bytes((SQ, C), f32)
                  + _padded_bytes((SQ * SQ, C), f32)
                  + _padded_bytes((1, C), f32))
    inter = (3 * _padded_bytes((SQ, TBW), f32)                # scale, zm, mean expansion
             + 2 * _padded_bytes((TB, TBW), f32)              # seg + iota temps
             + _padded_bytes((TBW, SQ), f32)                  # zm.T
             + 2 * _padded_bytes((TB, SQ, W), f32)            # zm3 (+ swapaxes copy)
             + _padded_bytes((TB, SQ, SQ), f32)               # cov
             + _padded_bytes((TB, SQ * SQ), f32)              # covcat
             + 2 * _padded_bytes((C, TBW), f32))              # ybig, product
    return io + params + inter


def _pick_block_batch(B, C, W, SQ, x_dtype, budget_bytes):
    """Pick TB (batch elements per grid step): must divide B, and keep the
    lane width TB*W either a multiple of 128 or the full array width (TB == B).
    Prefers the largest fitting TB that still leaves >= 2 grid steps (so the
    'parallel' axis can shard across both v7x TensorCores); otherwise the
    largest fitting TB."""
    divisors = [d for d in range(1, B + 1) if B % d == 0]
    aligned = [d for d in divisors if (d * W) % 128 == 0 or d == B]
    fitting = [d for d in aligned
               if _block_vmem_need(d, C, W, SQ, x_dtype) <= budget_bytes]
    if fitting:
        multi = [d for d in fitting if B // d >= 2]
        return max(multi) if multi else max(fitting)
    # Nothing fits the budget: best-effort smallest aligned block.
    return min(aligned, key=lambda d: _block_vmem_need(d, C, W, SQ, x_dtype))


@functools.partial(jax.jit, static_argnames=("block_batch",))
def gsop_forward(x, params, *, block_batch=None):
    """x: (B, C, 1, W) NCHW. Returns (B, C, 1, W)."""
    w1, b1, gamma, beta, rm, rv, rw_w3, rw_b2, w2_3, b2 = params
    del b1  # cancels exactly in the zero-mean step; not needed in the kernel
    B, C, H, W = x.shape
    assert H == 1, "GSoP forward requires H == 1 (squeeze(-2) semantics)"
    assert W > 1, "covariance normalizer is 1/(W-1); W must be > 1"
    # TODO(synk): general W needs padding+masking or a sublane relayout; keep
    # the cheap, layout-preserving sublane split for now.
    assert W % 8 == 0, "kernel assumes W is a multiple of the 8-row sublane tile"
    sq = w1.shape[0]

    # --- trace-time folding: BN(eval) into rw_conv, then rw_conv + pw_conv2
    # into a single (sq^2, C) matrix M_flat plus a lane-dense (1, C) constant.
    a = (gamma * jax.lax.rsqrt(rv + EPS)).reshape(sq)                 # (sq,)
    shift = beta.reshape(sq) - rm.reshape(sq) * a                     # (sq,)
    rw_w_f = rw_w3 * a[:, None, None]                                 # (sq, 4, sq)
    rw_b_f = rw_b2 + shift[:, None] * jnp.sum(rw_w3, axis=-1)         # (sq, 4)
    # mflat[g*sq + k, c] = sum_j w2_3[c, g, j] * rw_w_f[g, j, k]
    mflat = jnp.einsum('cgj,gjk->gkc', w2_3, rw_w_f).reshape(sq * sq, C)
    const = (jnp.einsum('cgj,gj->c', w2_3, rw_b_f) + b2[:, 0]).reshape(1, C)

    # bf16 activations: feed the MXU bf16 operands (f32 accumulation).
    w1_k = w1.astype(x.dtype) if x.dtype == jnp.bfloat16 else w1

    # Lane-dense, channels-major presentation of the slab (layout plumbing).
    xt = x.reshape(B, C, W).transpose(1, 0, 2).reshape(C, B * W)

    vmem_cap = _vmem_capacity_bytes()
    budget = min(int(vmem_cap * 0.6), 96 << 20)
    TB = block_batch if block_batch is not None else _pick_block_batch(
        B, C, W, sq, x.dtype, budget)
    assert B % TB == 0
    assert (TB * W) % 128 == 0 or TB == B, "block lane width must be 128-aligned"
    grid = (B // TB,)

    need = _block_vmem_need(TB, C, W, sq, x.dtype)
    vmem_limit = int(min(max(need + (4 << 20), 32 << 20),
                         vmem_cap - (16 << 20), 100 << 20))

    kernel = functools.partial(gsop_kernel, batch=TB, width=W)
    # TODO(synk): for very large fused weights, single-buffer the invariant
    # param specs (pl.Buffered(1)) or DMA them once into scratch.
    out_t = pl.pallas_call(
        kernel,
        out_shape=jax.ShapeDtypeStruct((C, B * W), x.dtype),
        grid=grid,
        in_specs=[
            pl.BlockSpec((C, TB * W), lambda i: (0, i)),      # x (channels-major)
            pl.BlockSpec((sq, C), lambda i: (0, 0)),          # pw_conv1 weight
            pl.BlockSpec((sq * sq, C), lambda i: (0, 0)),     # fused tail weight
            pl.BlockSpec((1, C), lambda i: (0, 0)),           # fused tail bias
        ],
        out_specs=pl.BlockSpec((C, TB * W), lambda i: (0, i)),
        compiler_params=pltpu.CompilerParams(
            dimension_semantics=("parallel",),
            vmem_limit_bytes=vmem_limit),
    )(xt, w1_k, mflat, const)
    return out_t.reshape(C, B, W).transpose(1, 0, 2).reshape(B, C, 1, W)


def gsop_ref(x, params):
    """Pure-JAX reference, faithful to the (unfused) PyTorch forward path."""
    w1, b1, gamma, beta, rm, rv, rw_w3, rw_b2, w2_3, b2 = params
    B, C, H, W = x.shape
    x3 = x.reshape(B, C, W).astype(jnp.float32)
    scale = jnp.einsum('sc,bcw->bsw', w1, x3) + b1[None]                # (B, sq, W)
    zm = scale - scale.mean(-1, keepdims=True)
    cov = jnp.einsum('bsw,btw->bst', zm, zm) / (W - 1)                  # (B, sq, sq)
    cov_bn = (cov - rm[None]) * jax.lax.rsqrt(rv[None] + EPS) * gamma[None] + beta[None]
    rw = jnp.einsum('gjk,bgk->bgj', rw_w3, cov_bn) + rw_b2[None]        # (B, sq, 4)
    y = jnp.einsum('cgj,bgj->bc', w2_3, rw) + b2[None, :, 0]            # (B, C)
    return (y[:, :, None] * x3).reshape(B, C, 1, W)


def make_params(key, in_channels, reduction_rate):
    sq = in_channels // reduction_rate
    ks = jax.random.split(key, 6)
    w1 = jax.random.normal(ks[0], (sq, in_channels), jnp.float32) * 0.1      # pw_conv1.weight
    b1 = jax.random.normal(ks[1], (sq, 1), jnp.float32) * 0.1                # pw_conv1.bias
    gamma = jnp.ones((sq, 1), jnp.float32)                                   # bn.weight
    beta = jnp.zeros((sq, 1), jnp.float32)                                   # bn.bias
    rm = jnp.zeros((sq, 1), jnp.float32)                                     # bn.running_mean
    rv = jnp.ones((sq, 1), jnp.float32)                                      # bn.running_var
    # rw_conv.weight (4*sq, 1, sq, 1) -> (sq, 4, sq): rw_w3[g, j, k] == w[4*g+j, 0, k, 0]
    rw_w = jax.random.normal(ks[2], (4 * sq, sq), jnp.float32) * 0.1
    rw_w3 = rw_w.reshape(sq, 4, sq)
    rw_b2 = (jax.random.normal(ks[3], (4 * sq,), jnp.float32) * 0.1).reshape(sq, 4)
    # pw_conv2.weight (C, 4*sq) -> (C, sq, 4): w2_3[c, g, j] == w2[c, 4*g+j]
    w2 = jax.random.normal(ks[4], (in_channels, 4 * sq), jnp.float32) * 0.1
    w2_3 = w2.reshape(in_channels, sq, 4)
    b2 = jax.random.normal(ks[5], (in_channels, 1), jnp.float32) * 0.1
    return (w1, b1, gamma, beta, rm, rv, rw_w3, rw_b2, w2_3, b2)


if __name__ == "__main__":
    reduction_rate = 4
    key = jax.random.PRNGKey(0)
    kx, kp, kx2 = jax.random.split(key, 3)

    # Small shape: B*W < 128, so the whole batch is a single lane-dense block.
    B, C, W = 4, 16, 16
    x = jax.random.normal(kx, (B, C, 1, W), jnp.float32)
    params = make_params(kp, C, reduction_rate)
    out = jax.block_until_ready(gsop_forward(x, params))
    ref = gsop_ref(x, params)
    np.testing.assert_allclose(np.asarray(out), np.asarray(ref), rtol=1e-4, atol=1e-4)
    assert out.shape == (B, C, 1, W)

    # Larger batch: exercises a multi-step grid with 128-aligned lane blocks
    # (TB = 8 -> TB*W = 128, grid = (2,) so the parallel axis can shard).
    B2 = 16
    x2 = jax.random.normal(kx2, (B2, C, 1, W), jnp.float32)
    out2 = jax.block_until_ready(gsop_forward(x2, params))
    ref2 = gsop_ref(x2, params)
    np.testing.assert_allclose(np.asarray(out2), np.asarray(ref2), rtol=1e-4, atol=1e-4)

    print("KERNEL_OK")
</pallas_src>

<mosaic_0001>
module attributes {stable_mosaic.version = 11 : i64} {
  func.func @gsop_kernel(%arg0: i32, %arg1: memref<16x64xf32, #tpu.memory_space<vmem>>, %arg2: memref<4x16xf32, #tpu.memory_space<vmem>>, %arg3: memref<16x16xf32, #tpu.memory_space<vmem>>, %arg4: memref<1x16xf32, #tpu.memory_space<vmem>>, %arg5: memref<16x64xf32, #tpu.memory_space<vmem>>) attributes {dimension_semantics = [#tpu.dimension_semantics<parallel>], iteration_bounds = array<i64: 1>, scalar_prefetch = 0 : i64, scratch_operands = 0 : i64, tpu.core_type = #tpu.core_type<tc>, window_params = [{transform_indices = @transform_0, window_bounds = array<i64: 16, 64>}, {pipeline_mode = #tpu.pipeline_mode<synchronous>, transform_indices = @transform_1, window_bounds = array<i64: 4, 16>}, {pipeline_mode = #tpu.pipeline_mode<synchronous>, transform_indices = @transform_2, window_bounds = array<i64: 16, 16>}, {pipeline_mode = #tpu.pipeline_mode<synchronous>, transform_indices = @transform_3, window_bounds = array<i64: 1, 16>}, {transform_indices = @transform_4, window_bounds = array<i64: 16, 64>}]} {
    %c0 = arith.constant 0 : index
    %c0_0 = arith.constant 0 : index
    %0 = vector.load %arg1[%c0, %c0_0] : memref<16x64xf32, #tpu.memory_space<vmem>>, vector<16x64xf32>
    %c0_1 = arith.constant 0 : index
    %c0_2 = arith.constant 0 : index
    %1 = vector.load %arg2[%c0_1, %c0_2] : memref<4x16xf32, #tpu.memory_space<vmem>>, vector<4x16xf32>
    %cst = arith.constant dense<0.000000e+00> : vector<4x64xf32>
    %2 = tpu.matmul %1, %0, %cst {dimension_numbers = #tpu.dot_dimension_numbers<[1], [0], [0], [1], [0, 0, 1, 1], [], []>} : vector<4x16xf32>, vector<16x64xf32>, vector<4x64xf32> -> vector<4x64xf32>
    %3 = tpu.iota {dimensions = array<i32: 1>} : vector<4x64xi32>
    %4 = tpu.iota {dimensions = array<i32: 0>} : vector<4x64xi32>
    %c16_i32 = arith.constant 16 : i32
    %5 = vector.broadcast %c16_i32 : i32 to vector<4x64xi32>
    %6 = arith.muli %4, %5 : vector<4x64xi32>
    %7 = arith.cmpi sge, %3, %6 : vector<4x64xi32>
    %c1_i32 = arith.constant 1 : i32
    %8 = vector.broadcast %c1_i32 : i32 to vector<4x64xi32>
    %9 = arith.addi %4, %8 : vector<4x64xi32>
    %c16_i32_3 = arith.constant 16 : i32
    %10 = vector.broadcast %c16_i32_3 : i32 to vector<4x64xi32>
    %11 = arith.muli %9, %10 : vector<4x64xi32>
    %12 = arith.cmpi slt, %3, %11 : vector<4x64xi32>
    %13 = arith.andi %7, %12 : vector<4x64xi1>
    %14 = arith.extui %13 : vector<4x64xi1> to vector<4x64xi32>
    %15 = arith.sitofp %14 : vector<4x64xi32> to vector<4x64xf32>
    %cst_4 = arith.constant dense<0.000000e+00> : vector<4x4xf32>
    %16 = tpu.matmul %2, %15, %cst_4 {dimension_numbers = #tpu.dot_dimension_numbers<[1], [1], [0], [0], [0, 0, 1, 0], [], []>} : vector<4x64xf32>, vector<4x64xf32>, vector<4x4xf32> -> vector<4x4xf32>
    %cst_5 = arith.constant 6.250000e-02 : f32
    %17 = vector.broadcast %cst_5 : f32 to vector<4x4xf32>
    %18 = arith.mulf %16, %17 : vector<4x4xf32>
    %cst_6 = arith.constant dense<0.000000e+00> : vector<4x64xf32>
    %19 = tpu.matmul %18, %15, %cst_6 {dimension_numbers = #tpu.dot_dimension_numbers<[1], [0], [0], [1], [0, 0, 1, 1], [], []>} : vector<4x4xf32>, vector<4x64xf32>, vector<4x64xf32> -> vector<4x64xf32>
    %20 = arith.subf %2, %19 : vector<4x64xf32>
    %21 = tpu.transpose %20, [1, 0] : vector<4x64xf32> -> vector<64x4xf32>
    %22 = vector.shape_cast %21 : vector<64x4xf32> to vector<4x16x4xf32>
    %23 = tpu.transpose %22, [0, 2, 1] : vector<4x16x4xf32> -> vector<4x4x16xf32>
    %cst_7 = arith.constant dense<0.000000e+00> : vector<4x4x4xf32>
    %24 = tpu.matmul %23, %23, %cst_7 {dimension_numbers = #tpu.dot_dimension_numbers<[2], [2], [1], [1], [0, 0, 0, 1, 1, 1], [0], [0]>} : vector<4x4x16xf32>, vector<4x4x16xf32>, vector<4x4x4xf32> -> vector<4x4x4xf32>
    %cst_8 = arith.constant 0.0666666701 : f32
    %25 = vector.broadcast %cst_8 : f32 to vector<4x4x4xf32>
    %26 = arith.mulf %24, %25 : vector<4x4x4xf32>
    %27 = vector.extract_strided_slice %26 {offsets = [0, 0, 0], sizes = [4, 1, 4], strides = [1, 1, 1]} : vector<4x4x4xf32> to vector<4x1x4xf32>
    %28 = vector.shape_cast %27 : vector<4x1x4xf32> to vector<4x4xf32>
    %29 = vector.extract_strided_slice %26 {offsets = [0, 1, 0], sizes = [4, 1, 4], strides = [1, 1, 1]} : vector<4x4x4xf32> to vector<4x1x4xf32>
    %30 = vector.shape_cast %29 : vector<4x1x4xf32> to vector<4x4xf32>
    %31 = vector.extract_strided_slice %26 {offsets = [0, 2, 0], sizes = [4, 1, 4], strides = [1, 1, 1]} : vector<4x4x4xf32> to vector<4x1x4xf32>
    %32 = vector.shape_cast %31 : vector<4x1x4xf32> to vector<4x4xf32>
    %33 = vector.extract_strided_slice %26 {offsets = [0, 3, 0], sizes = [4, 1, 4], strides = [1, 1, 1]} : vector<4x4x4xf32> to vector<4x1x4xf32>
    %34 = vector.shape_cast %33 : vector<4x1x4xf32> to vector<4x4xf32>
    %35 = tpu.concatenate %28, %30, %32, %34 in 1 : vector<4x4xf32>, vector<4x4xf32>, vector<4x4xf32>, vector<4x4xf32> -> vector<4x16xf32>
    %c0_9 = arith.constant 0 : index
    %c0_10 = arith.constant 0 : index
    %36 = vector.load %arg3[%c0_9, %c0_10] : memref<16x16xf32, #tpu.memory_space<vmem>>, vector<16x16xf32>
    %cst_11 = arith.constant dense<0.000000e+00> : vector<4x16xf32>
    %37 = tpu.matmul %35, %36, %cst_11 {dimension_numbers = #tpu.dot_dimension_numbers<[1], [0], [0], [1], [0, 0, 1, 1], [], []>} : vector<4x16xf32>, vector<16x16xf32>, vector<4x16xf32> -> vector<4x16xf32>
    %c0_12 = arith.constant 0 : index
    %c0_13 = arith.constant 0 : index
    %38 = vector.load %arg4[%c0_12, %c0_13] : memref<1x16xf32, #tpu.memory_space<vmem>>, vector<1x16xf32>
    %39 = vector.broadcast %38 : vector<1x16xf32> to vector<4x16xf32>
    %40 = arith.addf %37, %39 : vector<4x16xf32>
    %41 = tpu.transpose %40, [1, 0] : vector<4x16xf32> -> vector<16x4xf32>
    %cst_14 = arith.constant dense<0.000000e+00> : vector<16x64xf32>
    %42 = tpu.matmul %41, %15, %cst_14 {dimension_numbers = #tpu.dot_dimension_numbers<[1], [0], [0], [1], [0, 0, 1, 1], [], []>} : vector<16x4xf32>, vector<4x64xf32>, vector<16x64xf32> -> vector<16x64xf32>
    %43 = arith.mulf %42, %0 : vector<16x64xf32>
    %c0_15 = arith.constant 0 : index
    %c0_16 = arith.constant 0 : index
    %44 = vector.load %arg5[%c0_15, %c0_16] : memref<16x64xf32, #tpu.memory_space<vmem>>, vector<16x64xf32>
    tpu.vector_store %arg5[%c0_15, %c0_16], %43 {strides = array<i32>} : memref<16x64xf32, #tpu.memory_space<vmem>>, vector<16x64xf32>,
    return
  }
  func.func @transform_0(%arg0: i32) -> (i32, i32) {
    %c0_i32 = arith.constant 0 : i32
    %c0_i32_0 = arith.constant 0 : i32
    return %c0_i32, %arg0 : i32, i32
  }
  func.func @transform_1(%arg0: i32) -> (i32, i32) {
    %c0_i32 = arith.constant 0 : i32
    %c0_i32_0 = arith.constant 0 : i32
    %c0_i32_1 = arith.constant 0 : i32
    return %c0_i32, %c0_i32_0 : i32, i32
  }
  func.func @transform_2(%arg0: i32) -> (i32, i32) {
    %c0_i32 = arith.constant 0 : i32
    %c0_i32_0 = arith.constant 0 : i32
    %c0_i32_1 = arith.constant 0 : i32
    return %c0_i32, %c0_i32_0 : i32, i32
  }
  func.func @transform_3(%arg0: i32) -> (i32, i32) {
    %c0_i32 = arith.constant 0 : i32
    %c0_i32_0 = arith.constant 0 : i32
    %c0_i32_1 = arith.constant 0 : i32
    return %c0_i32, %c0_i32_0 : i32, i32
  }
  func.func @transform_4(%arg0: i32) -> (i32, i32) {
    %c0_i32 = arith.constant 0 : i32
    %c0_i32_0 = arith.constant 0 : i32
    return %c0_i32, %arg0 : i32, i32
  }
}

</mosaic_0001>

<bundles_post_ra>
// kernel: gsop_forward.1
= control target key start
LH: loop header
LB: loop body
LE: loop exit
PB: predicated region body
PF: predicated region fallthrough
CT: control target
= control target key end

     0   :  { %v44_v0 = vlaneseq  ;;  %vm20_vm0 = vcmask 130048   ;;  %vm56_vm3 = vcmask 523264   ;;  %v535_v9 = vmov 0.0   ;;  %s538_s21 = smov 4   ;;  %s624_s0 = inlined_call_operand.vmem [shape: f32[16,64], index: 0, kind: input, shape index: {}]   ;;  %s625_s1 = inlined_call_operand.vmem [shape: f32[4,16], index: 1, kind: input, shape index: {}]   ;;  %s626_s3 = inlined_call_operand.vmem [shape: f32[1,16], index: 3, kind: input, shape index: {}]   ;;  %s627_s2 = inlined_call_operand.vmem [shape: f32[16,16], index: 2, kind: input, shape index: {}]   ;;  %s628_s4 = inlined_call_operand.vmem [shape: f32[16,64], index: 4, kind: output, shape index: {}]  }
   0x1   :  { %v567_v1 = vld [vmem:[%s624_s0 + $0x8] sm:$0xff]  ;;  %v572_v2 = vld [vmem:[%s624_s0] sm:$0xff]  ;;  %vm88_vm5 = vcmask 1043456   ;;  %vm84_vm6 = vcmask 31744   ;;  %vm373_vm7 = vcmask 1041409   ;;  %vm376_vm8 = vcmask 1042434  }
   0x2   :  { %38 = vmatpush.msra.mxu0 %v567_v1  ;;  %v19_v3 = vld [vmem:[%s625_s1] sm:$0xf]  ;;  %v45_v4 = vand.u32 127, %v44_v0  ;;  %v47_v5 = vshrl.u32 %v44_v0, 7  ;;  %vm379_vm9 = vcmask 1043459   ;;  %s536_s0 = smov 12  }
   0x3   :  { %s537_s1 = smov 8   ;;  %v415_v60 = vld [vmem:[%s627_s2 + $0x8] sm:$0xff]  ;;  %v414_v61 = vld [vmem:[%s627_s2] sm:$0xff]  ;;  %vm410_vm10 = vcmask 64512   ;;  %vm412_vm11 = vcmask 97280  }
   0x4   :  { %39 = vmatpush.msra.mxu0 %v572_v2  ;;  %v48_v6 = vmul.u32 16, %v47_v5  ;;  %v50_v7 = vadd.s32 1, %v47_v5 }
   0x5   :  { %512 = vmatmul.msk.f32.vlgmr.msra.gmra.mxu0 %vm20_vm0, %v19_v3 }
   0x6   :  { %vm49_vm1 = vcmp.ge.s32.totalorder %v45_v4, %v48_v6  ;;  %v51_v8 = vmul.u32 16, %v50_v7  ;;  %v534_v6 = vld [vmem:[%s626_s3] ss:$0 sm:$0xff] }
   0x8   :  { %vm52_vm2 = vcmp.lt.s32.totalorder %v45_v4, %v51_v8 }
   0x9   :  { %vm53_vm4 = vmand %vm49_vm1, %vm52_vm2 }
   0xa   :  { %v513_v10 = vsel %vm53_vm4, 1.0, %v535_v9 }
   0xb   :  { %514 = vmatpush.xpose.msk.msra.mxu1 %vm56_vm3, %v513_v10  ;;  %516 = vmatpush.msk.msrb.mxu0 %vm88_vm5, %v513_v10 }
  0x82   :  { %v41_v11 = vpop.f32.mrf.mxu0 }
  0x83   :  { %515 = vmatmul.msk.f32.vlgmr.msra.gmra.mxu1 %vm56_vm3, %v41_v11 }
 0x100   :  { %v80_v12 = vpop.f32.mrf.mxu1 }
 0x101   :  { %v83_v13 = vmul.f32 0.0625, %v80_v12 }
 0x103   :  { %517 = vmatmul.msk.f32.vlgmr.msrb.gmra.mxu0 %vm84_vm6, %v83_v13 }
 0x180   :  { %v108_v14 = vpop.f32.mrf.mxu0 }
 0x181   :  { %v111_v15 = vsub.f32 %v41_v11, %v108_v14 }
 0x183   :  { %112 = vxpose.xlu0.b32.start.end [1/1] (short) (narrow) %v111_v15, 64 }
 0x227   :  { %v128_v16 = vpop.trf.xlu0 }
 0x228   :  { %144 = vxpose.xlu0.b32.start [1/2] (short) (narrow) %v128_v16, 8 }
 0x22f   :  { %v129_v17 = vpop.trf.xlu0 }
 0x230   :  { %145 = vxpose.xlu0.b32.end [2/2] (short) (narrow) %v129_v17, 8 }
 0x237   :  { %v130_v18 = vpop.trf.xlu0 }
 0x238   :  { %176 = vxpose.xlu1.b32.start [1/2] (short) (narrow) %v130_v18, 8 }
 0x23f   :  { %v131_v19 = vpop.trf.xlu0 }
 0x240   :  { %177 = vxpose.xlu1.b32.end [2/2] (short) (narrow) %v131_v19, 8 }
 0x247   :  { %v132_v20 = vpop.trf.xlu0 }
 0x248   :  { %208 = vxpose.xlu2.b32.start [1/2] (short) (narrow) %v132_v20, 8 }
 0x24f   :  { %v133_v21 = vpop.trf.xlu0 }
 0x250   :  { %209 = vxpose.xlu2.b32.end [2/2] (short) (narrow) %v133_v21, 8 }
 0x257   :  { %v134_v22 = vpop.trf.xlu0 }
 0x258   :  { %240 = vxpose.xlu1.b32.start [1/2] (short) (narrow) %v134_v22, 8 }
 0x25f   :  { %v135_v23 = vpop.trf.xlu0 }
 0x260   :  { %241 = vxpose.xlu1.b32.end [2/2] (short) (narrow) %v135_v23, 8 }
 0x2cc   :  { %v160_v24 = vpop.trf.xlu0 }
 0x2cd   :  { %518 = vmatpush.xpose.msk.msra.mxu3 %vm20_vm0, %v160_v24 }
 0x2d0   :  { %519 = vmatmul.msk.f32.vlgmr.msra.gmra.mxu3 %vm20_vm0, %v160_v24 }
 0x2d1   :  { %437 = vmatpush.msrb.mxu3 %v415_v60 }
 0x2d3   :  { %438 = vmatpush.msrb.mxu3 %v414_v61 }
 0x2dc   :  { %v192_v25 = vpop.trf.xlu1 }
 0x2dd   :  { %520 = vmatpush.xpose.msk.msra.mxu2 %vm20_vm0, %v192_v25 }
 0x2e0   :  { %521 = vmatmul.msk.f32.vlgmr.msra.gmra.mxu2 %vm20_vm0, %v192_v25 }
 0x2e1   :  { %527 = vmatpush.msk.msrb.mxu2 %vm88_vm5, %v513_v10  ;;  %v224_v26 = vpop.trf.xlu2 }
 0x2e2   :  { %522 = vmatpush.xpose.msk.msra.mxu0 %vm20_vm0, %v224_v26 }
 0x2e5   :  { %523 = vmatmul.msk.f32.vlgmr.msra.gmra.mxu0 %vm20_vm0, %v224_v26 }
 0x2fc   :  { %v256_v27 = vpop.trf.xlu1 }
 0x2fd   :  { %524 = vmatpush.xpose.msk.msrb.mxu1 %vm20_vm0, %v256_v27 }
 0x300   :  { %525 = vmatmul.msk.f32.vlgmr.msrb.gmra.mxu1 %vm20_vm0, %v256_v27 }
 0x353   :  { %v292_v29 = vpop.f32.mrf.mxu3 }
 0x354   :  { %v364_v34 = vmul.f32 0.06666667, %v292_v29 }
 0x356   :  { %v400_v38 = vrot.slane %v364_v34, 3  ;;  %v382_v41 = vrot.slane %v364_v34, 1  ;;  %v391_v42 = vrot.slane %v364_v34, 2 }
 0x362   :  { %v338_v28 = vpop.f32.mrf.mxu0 }
 0x363   :  { %v315_v30 = vpop.f32.mrf.mxu2  ;;  %v366_v31 = vmul.f32 0.06666667, %v338_v28 }
 0x364   :  { %v365_v32 = vmul.f32 0.06666667, %v315_v30 }
 0x365   :  { %v375_v33 = vrot.slane %v366_v31, 6  ;;  %v403_v40 = vrot.slane %v366_v31, 1  ;;  %v384_v45 = vrot.slane %v366_v31, 7 }
 0x366   :  { %v372_v35 = vrot.slane %v365_v32, 7  ;;  %v401_v39 = vrot.slane %v365_v32, 2  ;;  %v392_v43 = vrot.slane %v365_v32, 1  ;;  %v383_v50 = vsel %vm373_vm7, %v365_v32, %v382_v41 }
 0x367   :  { %v385_v56 = vsel %vm376_vm8, %v384_v45, %v383_v50 }
 0x368   :  { %v374_v36 = vsel %vm373_vm7, %v372_v35, %v364_v34  ;;  %v402_v44 = vsel %vm373_vm7, %v401_v39, %v400_v38  ;;  %v393_v49 = vsel %vm373_vm7, %v392_v43, %v391_v42 }
 0x369   :  { %v377_v37 = vsel %vm376_vm8, %v375_v33, %v374_v36  ;;  %v404_v47 = vsel %vm376_vm8, %v403_v40, %v402_v44  ;;  %v394_v55 = vsel %vm376_vm8, %v366_v31, %v393_v49 }
 0x37d   :  { %v361_v46 = vpop.f32.mrf.mxu1 }
 0x37e   :  { %v367_v48 = vmul.f32 0.06666667, %v361_v46 }
 0x380   :  { %v378_v51 = vrot.slane %v367_v48, 5  ;;  %v405_v52 = vsel %vm379_vm9, %v367_v48, %v404_v47  ;;  %v395_v53 = vrot.slane %v367_v48, 7  ;;  %v386_v54 = vrot.slane %v367_v48, 6 }
 0x381   :  { %406 = vrot.lane.b32.xlu0 %v405_v52, %s536_s0 }
 0x382   :  { %v396_v57 = vsel %vm379_vm9, %v395_v53, %v394_v55  ;;  %v387_v58 = vsel %vm379_vm9, %v386_v54, %v385_v56  ;;  %v380_v59 = vsel %vm379_vm9, %v378_v51, %v377_v37 }
 0x383   :  { %397 = vrot.lane.b32.xlu1 %v396_v57, %s537_s1  ;;  %388 = vrot.lane.b32.xlu2 %v387_v58, %s538_s21 }
 0x3dd   :  { %v389_v62 = vpop.permute.xlu2 %388 }
 0x3de   :  { %v409_v63 = vsel %vm84_vm6, %v380_v59, %v389_v62 }
 0x3f3   :  { %v407_v3 = vpop.permute.xlu0 %406 }
 0x3f5   :  { %v398_v0 = vpop.permute.xlu1 %397 }
 0x3f6   :  { %v411_v4 = vsel %vm410_vm10, %v409_v63, %v398_v0 }
 0x3f7   :  { %v413_v5 = vsel %vm412_vm11, %v411_v4, %v407_v3 }
 0x3f8   :  { %526 = vmatmul.msk.f32.vlgmr.msrb.gmra.mxu3 %vm20_vm0, %v413_v5 }
 0x47b   :  { %v440_v7 = vpop.f32.mrf.mxu3 }
 0x47c   :  { %v441_v8 = vadd.f32 %v534_v6, %v440_v7 }
 0x47e   :  { %443 = vxpose.xlu2.b32.start.end [1/1] (short) (narrow) %v441_v8, 16 }
 0x517   :  { %v459_v9 = vpop.trf.xlu2 }
 0x518   :  { %528 = vmatmul.msk.f32.vlgmr.msrb.gmra.mxu2 %vm84_vm6, %v459_v9 }
 0x51f   :  { %v460_v10 = vpop.trf.xlu2 }
 0x520   :  { %529 = vmatmul.msk.f32.gmra.mxu2 %vm84_vm6, %v460_v10 }
 0x59b   :  { %v498_v11 = vpop.f32.mrf.mxu2 }
 0x59c   :  { %v504_v12 = vmul.f32 %v498_v11, %v572_v2 }
 0x59e   :  { %506 = vst.msk [vmem:[%s628_s4] sm:$0xff] %vm56_vm3, %v504_v12 }
 0x5a3   :  { %v501_v13 = vpop.f32.mrf.mxu2 }
 0x5a4   :  { %v505_v14 = vmul.f32 %v501_v13, %v567_v1 }
 0x5a6   :  { %507 = vst.msk [vmem:[%s628_s4 + $0x8] sm:$0xff] %vm56_vm3, %v505_v14 }

</bundles_post_ra>
